<compile_context>
chip_gen: v7x
topology: tpu7x:2x2x1
jax: 0.10.0
libtpu: 0.0.40
codegen_flags: <defaults>
</compile_context>

<pallas_src>
import math
import functools

import jax
import jax.numpy as jnp
from jax.experimental import pallas as pl
from jax.experimental.pallas import tpu as pltpu


# ----------------------------------------------------------------------------
# Kernel 1: full scores S = Q K^T  +  ProbSparse measure M
# ----------------------------------------------------------------------------
def _scores_kernel(q_ref, k_ref, w_ref, s_ref, m_ref, *, l_k):
    # q_ref: (1, L_Q, E), k_ref: (1, L_K, E), w_ref: (L_Q, L_K) sample counts (grid-invariant)
    q = q_ref[0].astype(jnp.float32)
    k = k_ref[0].astype(jnp.float32)
    # S = Q @ K^T  (MXU, f32 accumulation)
    s = jax.lax.dot_general(q, k, (((1,), (1,)), ((), ())),
                            preferred_element_type=jnp.float32)        # (L_Q, L_K)
    w = w_ref[...]                                                     # (L_Q, L_K) counts
    sampled_max = jnp.max(jnp.where(w > 0.0, s, -jnp.inf),
                          axis=-1, keepdims=True)                      # (L_Q, 1)
    sampled_sum = jnp.sum(s * w, axis=-1, keepdims=True)               # duplicates counted
    m_ref[0] = sampled_max - sampled_sum * (1.0 / l_k)
    s_ref[0] = s.astype(s_ref.dtype)


def _scores_and_measure(q, k, w):
    hb, l_q, e = q.shape
    _, l_k, _ = k.shape
    kern = functools.partial(_scores_kernel, l_k=l_k)
    return pl.pallas_call(
        kern,
        out_shape=(
            jax.ShapeDtypeStruct((hb, l_q, l_k), jnp.float32),   # full scores S
            jax.ShapeDtypeStruct((hb, l_q, 1), jnp.float32),     # sparsity measure M
        ),
        grid_spec=pltpu.PrefetchScalarGridSpec(
            num_scalar_prefetch=0,
            grid=(hb,),
            in_specs=[
                pl.BlockSpec((1, l_q, e), lambda g: (g, 0, 0)),
                pl.BlockSpec((1, l_k, e), lambda g: (g, 0, 0)),
                # grid-invariant sample-count matrix: same block every step -> no re-DMA
                pl.BlockSpec((l_q, l_k), lambda g: (0, 0)),
            ],
            out_specs=[
                pl.BlockSpec((1, l_q, l_k), lambda g: (g, 0, 0)),
                pl.BlockSpec((1, l_q, 1), lambda g: (g, 0, 0)),
            ],
        ),
        compiler_params=pltpu.CompilerParams(
            dimension_semantics=("parallel",)),
    )(q, k, w)


# ----------------------------------------------------------------------------
# Kernel 2: gather top rows, softmax, attn @ V, mean(V) context, scatter back
# ----------------------------------------------------------------------------
def _context_kernel(s_ref, psel_ref, pscat_ref, v_ref, o_ref, *, inv_scale, l_k):
    s = s_ref[0]                                                   # (L_Q, L_K) f32
    p_sel = psel_ref[0]                                            # (u, L_Q) one-hot rows
    p_scat = pscat_ref[0]                                          # (L_Q, u) = p_sel^T
    v = v_ref[0].astype(jnp.float32)                               # (L_K, D)

    # row gather of the top-u score rows, as a one-hot matmul (exact: 1*x + 0*y)
    s_top = jnp.dot(p_sel, s, preferred_element_type=jnp.float32)  # (u, L_K)
    logits = s_top * inv_scale
    mx = jnp.max(logits, axis=-1, keepdims=True)
    ex = jnp.exp(logits - mx)
    attn = ex / jnp.sum(ex, axis=-1, keepdims=True)
    upd = jnp.dot(attn, v, preferred_element_type=jnp.float32)     # (u, D)

    # initial context = mean(V) broadcast; overwrite the selected query rows with `upd`
    v_mean = jnp.sum(v, axis=0, keepdims=True) * (1.0 / l_k)       # (1, D)
    covered = jnp.sum(p_scat, axis=-1, keepdims=True)              # (L_Q, 1) in {0,1}
    ctx = (1.0 - covered) * v_mean + jnp.dot(
        p_scat, upd, preferred_element_type=jnp.float32)           # (L_Q, D)
    o_ref[0] = ctx.astype(o_ref.dtype)


def _update_context(s, p_sel, p_scat, v, *, inv_scale):
    hb, l_q, l_k = s.shape
    u = p_sel.shape[1]
    d = v.shape[-1]
    kern = functools.partial(_context_kernel, inv_scale=inv_scale, l_k=l_k)
    return pl.pallas_call(
        kern,
        out_shape=jax.ShapeDtypeStruct((hb, l_q, d), jnp.float32),
        grid_spec=pltpu.PrefetchScalarGridSpec(
            num_scalar_prefetch=0,
            grid=(hb,),
            in_specs=[
                pl.BlockSpec((1, l_q, l_k), lambda g: (g, 0, 0)),
                pl.BlockSpec((1, u, l_q), lambda g: (g, 0, 0)),
                pl.BlockSpec((1, l_q, u), lambda g: (g, 0, 0)),
                pl.BlockSpec((1, l_k, d), lambda g: (g, 0, 0)),
            ],
            out_specs=pl.BlockSpec((1, l_q, d), lambda g: (g, 0, 0)),
        ),
        compiler_params=pltpu.CompilerParams(
            dimension_semantics=("parallel",)),
    )(s, p_sel, p_scat, v)


# ----------------------------------------------------------------------------
# Wrapper: full ProbAttention forward (mask=None path of the original module)
# ----------------------------------------------------------------------------
def prob_attention(Q, K, V, index_sample, *, factor, head_depth=16, return_index=False):
    """Q,K: (H,B,L,E); V: (H,B,L_K,D); index_sample: (L_Q, sample_k) int key samples."""
    H, B, L_Q, E = Q.shape
    _, _, L_K, _ = K.shape
    D = V.shape[-1]
    HB = H * B
    u = min(factor * int(math.ceil(math.log(L_Q))), L_Q)

    q = Q.reshape(HB, L_Q, E).astype(jnp.float32)
    k = K.reshape(HB, L_K, E).astype(jnp.float32)
    v = V.reshape(HB, L_K, D).astype(jnp.float32)

    # count matrix: w[i, j] = #{s : index_sample[i, s] == j}  (replacement sampling, like torch.randint)
    w = jnp.sum(index_sample[:, :, None] == jnp.arange(L_K)[None, None, :],
                axis=1).astype(jnp.float32)                            # (L_Q, L_K)

    s, m = _scores_and_measure(q, k, w)

    # TODO(synk): top-k (data-dependent selection) has no clean Pallas TPU equivalent; done in JAX.
    _, index = jax.lax.top_k(m[..., 0], u)                             # (HB, u)

    # one-hot matrices used inside kernel 2 for gather (rows of S) and scatter (rows of context)
    p_sel = jax.nn.one_hot(index, L_Q, dtype=jnp.float32)              # (HB, u, L_Q)
    p_scat = jnp.swapaxes(p_sel, 1, 2)                                 # (HB, L_Q, u)

    ctx = _update_context(s, p_sel, p_scat, v,
                          inv_scale=1.0 / math.sqrt(head_depth))
    ctx = ctx.reshape(H, B, L_Q, D)
    if return_index:
        return ctx, index.reshape(H, B, u)
    return ctx


# ----------------------------------------------------------------------------
# Pure-JAX reference mirroring the PyTorch module (for the correctness check)
# ----------------------------------------------------------------------------
def ref_prob_attention(Q, K, V, index_sample, *, factor, head_depth=16, index=None):
    H, B, L_Q, E = Q.shape
    _, _, L_K, _ = K.shape
    D = V.shape[-1]
    u = min(factor * int(math.ceil(math.log(L_Q))), L_Q)
    hi = jax.lax.Precision.HIGHEST

    K_sample = K[:, :, index_sample, :]                                # (H,B,L_Q,S,E)
    QK_sample = jnp.einsum('hbqe,hbqse->hbqs', Q, K_sample, precision=hi)
    M = QK_sample.max(axis=-1) - QK_sample.sum(axis=-1) / L_K          # (H,B,L_Q)
    if index is None:
        _, index = jax.lax.top_k(M, u)                                 # (H,B,u)

    hh = jnp.arange(H)[:, None, None]
    bb = jnp.arange(B)[None, :, None]
    Q_reduce = Q[hh, bb, index]                                        # (H,B,u,E)
    scores_top = jnp.einsum('hbue,hbke->hbuk', Q_reduce, K, precision=hi)
    logits = scores_top / math.sqrt(head_depth)
    attn = jax.nn.softmax(logits, axis=-1)
    context = jnp.broadcast_to(V.mean(axis=2, keepdims=True), (H, B, L_Q, D))
    upd = jnp.einsum('hbuk,hbkd->hbud', attn, V, precision=hi)
    context = context.at[hh, bb, index].set(upd)
    return context, M


if __name__ == "__main__":
    key = jax.random.PRNGKey(0)
    H, B, L_Q, L_K, D = 2, 2, 16, 16, 16   # heads, batch, n_queries, n_keys, head_depth
    factor = 2
    head_depth = 16

    kq, kk, kv, ks = jax.random.split(key, 4)
    Q = jax.random.normal(kq, (H, B, L_Q, D), dtype=jnp.float32)
    K = jax.random.normal(kk, (H, B, L_K, D), dtype=jnp.float32)
    V = jax.random.normal(kv, (H, B, L_K, D), dtype=jnp.float32)

    # torch.randint(L_K, (L_Q, sample_k)) equivalent (with replacement), deterministic here.
    sample_k = factor * int(math.ceil(math.log(L_K)))
    index_sample = jax.random.randint(ks, (L_Q, sample_k), 0, L_K)

    out, index = prob_attention(Q, K, V, index_sample, factor=factor,
                                head_depth=head_depth, return_index=True)
    out = jax.block_until_ready(out)
    assert out.shape == (H, B, L_Q, D)

    u = index.shape[-1]
    # Check 1: the kernel-selected top-u queries carry the same sparsity-measure values
    # as the reference's own top-u (robust to ties / matmul-precision rounding).
    _, M_ref = ref_prob_attention(Q, K, V, index_sample, factor=factor, head_depth=head_depth)
    ref_top_vals, _ = jax.lax.top_k(M_ref, u)
    kern_vals = jnp.take_along_axis(M_ref, index, axis=-1)
    assert jnp.allclose(jnp.sort(kern_vals, axis=-1), jnp.sort(ref_top_vals, axis=-1),
                        atol=2e-2, rtol=2e-2), "top-k measure mismatch vs reference"

    # Check 2: full forward output, evaluated at the kernel's selected indices.
    ref_out, _ = ref_prob_attention(Q, K, V, index_sample, factor=factor,
                                    head_depth=head_depth, index=index)
    assert jnp.allclose(out, ref_out, atol=2e-2, rtol=2e-2), "mismatch vs reference"

    print("KERNEL_OK")
</pallas_src>

<mosaic_0001>
module attributes {stable_mosaic.version = 11 : i64} {
  func.func @_scores_kernel(%arg0: i32, %arg1: memref<1x16x16xf32, #tpu.memory_space<vmem>>, %arg2: memref<1x16x16xf32, #tpu.memory_space<vmem>>, %arg3: memref<16x16xf32, #tpu.memory_space<vmem>>, %arg4: memref<1x16x16xf32, #tpu.memory_space<vmem>>, %arg5: memref<1x16x1xf32, #tpu.memory_space<vmem>>) attributes {dimension_semantics = [#tpu.dimension_semantics<parallel>], iteration_bounds = array<i64: 4>, scalar_prefetch = 0 : i64, scratch_operands = 0 : i64, tpu.core_type = #tpu.core_type<tc>, window_params = [{transform_indices = @transform_0, window_bounds = array<i64: 1, 16, 16>}, {transform_indices = @transform_1, window_bounds = array<i64: 1, 16, 16>}, {pipeline_mode = #tpu.pipeline_mode<synchronous>, transform_indices = @transform_2, window_bounds = array<i64: 16, 16>}, {transform_indices = @transform_3, window_bounds = array<i64: 1, 16, 16>}, {transform_indices = @transform_4, window_bounds = array<i64: 1, 16, 1>}]} {
    %c0 = arith.constant 0 : index
    %c0_0 = arith.constant 0 : index
    %c0_1 = arith.constant 0 : index
    %0 = vector.load %arg1[%c0, %c0_0, %c0_1] : memref<1x16x16xf32, #tpu.memory_space<vmem>>, vector<1x16x16xf32>
    %1 = vector.shape_cast %0 : vector<1x16x16xf32> to vector<16x16xf32>
    %c0_2 = arith.constant 0 : index
    %c0_3 = arith.constant 0 : index
    %c0_4 = arith.constant 0 : index
    %2 = vector.load %arg2[%c0_2, %c0_3, %c0_4] : memref<1x16x16xf32, #tpu.memory_space<vmem>>, vector<1x16x16xf32>
    %3 = vector.shape_cast %2 : vector<1x16x16xf32> to vector<16x16xf32>
    %cst = arith.constant dense<0.000000e+00> : vector<16x16xf32>
    %4 = tpu.matmul %1, %3, %cst {dimension_numbers = #tpu.dot_dimension_numbers<[1], [1], [0], [0], [0, 0, 1, 0], [], []>} : vector<16x16xf32>, vector<16x16xf32>, vector<16x16xf32> -> vector<16x16xf32>
    %c0_5 = arith.constant 0 : index
    %c0_6 = arith.constant 0 : index
    %5 = vector.load %arg3[%c0_5, %c0_6] : memref<16x16xf32, #tpu.memory_space<vmem>>, vector<16x16xf32>
    %cst_7 = arith.constant 0.000000e+00 : f32
    %6 = vector.broadcast %cst_7 : f32 to vector<16x16xf32>
    %7 = arith.cmpf ogt, %5, %6 : vector<16x16xf32>
    %cst_8 = arith.constant 0xFF800000 : f32
    %8 = vector.broadcast %cst_8 : f32 to vector<16x16xf32>
    %9 = arith.select %7, %4, %8 : vector<16x16xi1>, vector<16x16xf32>
    %cst_9 = arith.constant dense<0xFF800000> : vector<16xf32>
    %10 = vector.multi_reduction <maximumf>, %9, %cst_9 [1] : vector<16x16xf32> to vector<16xf32>
    %11 = vector.shape_cast %10 : vector<16xf32> to vector<16x1xf32>
    %12 = arith.mulf %4, %5 : vector<16x16xf32>
    %cst_10 = arith.constant dense<0.000000e+00> : vector<16xf32>
    %13 = vector.multi_reduction <add>, %12, %cst_10 [1] : vector<16x16xf32> to vector<16xf32>
    %14 = vector.shape_cast %13 : vector<16xf32> to vector<16x1xf32>
    %cst_11 = arith.constant 6.250000e-02 : f32
    %15 = vector.broadcast %cst_11 : f32 to vector<16x1xf32>
    %16 = arith.mulf %14, %15 : vector<16x1xf32>
    %17 = arith.subf %11, %16 : vector<16x1xf32>
    %c0_12 = arith.constant 0 : index
    %c0_13 = arith.constant 0 : index
    %c0_14 = arith.constant 0 : index
    %18 = vector.load %arg5[%c0_12, %c0_13, %c0_14] : memref<1x16x1xf32, #tpu.memory_space<vmem>>, vector<1x16x1xf32>
    %19 = vector.shape_cast %18 : vector<1x16x1xf32> to vector<16x1xf32>
    %20 = vector.shape_cast %17 : vector<16x1xf32> to vector<1x16x1xf32>
    tpu.vector_store %arg5[%c0_12, %c0_13, %c0_14], %20 {strides = array<i32>} : memref<1x16x1xf32, #tpu.memory_space<vmem>>, vector<1x16x1xf32>,
    %c0_15 = arith.constant 0 : index
    %c0_16 = arith.constant 0 : index
    %c0_17 = arith.constant 0 : index
    %21 = vector.load %arg4[%c0_15, %c0_16, %c0_17] : memref<1x16x16xf32, #tpu.memory_space<vmem>>, vector<1x16x16xf32>
    %22 = vector.shape_cast %21 : vector<1x16x16xf32> to vector<16x16xf32>
    %23 = vector.shape_cast %4 : vector<16x16xf32> to vector<1x16x16xf32>
    tpu.vector_store %arg4[%c0_15, %c0_16, %c0_17], %23 {strides = array<i32>} : memref<1x16x16xf32, #tpu.memory_space<vmem>>, vector<1x16x16xf32>,
    return
  }
  func.func @transform_0(%arg0: i32) -> (i32, i32, i32) {
    %c0_i32 = arith.constant 0 : i32
    %c0_i32_0 = arith.constant 0 : i32
    %c0_i32_1 = arith.constant 0 : i32
    return %arg0, %c0_i32, %c0_i32_0 : i32, i32, i32
  }
  func.func @transform_1(%arg0: i32) -> (i32, i32, i32) {
    %c0_i32 = arith.constant 0 : i32
    %c0_i32_0 = arith.constant 0 : i32
    %c0_i32_1 = arith.constant 0 : i32
    return %arg0, %c0_i32, %c0_i32_0 : i32, i32, i32
  }
  func.func @transform_2(%arg0: i32) -> (i32, i32) {
    %c0_i32 = arith.constant 0 : i32
    %c0_i32_0 = arith.constant 0 : i32
    %c0_i32_1 = arith.constant 0 : i32
    return %c0_i32, %c0_i32_0 : i32, i32
  }
  func.func @transform_3(%arg0: i32) -> (i32, i32, i32) {
    %c0_i32 = arith.constant 0 : i32
    %c0_i32_0 = arith.constant 0 : i32
    %c0_i32_1 = arith.constant 0 : i32
    return %arg0, %c0_i32, %c0_i32_0 : i32, i32, i32
  }
  func.func @transform_4(%arg0: i32) -> (i32, i32, i32) {
    %c0_i32 = arith.constant 0 : i32
    %c0_i32_0 = arith.constant 0 : i32
    %c0_i32_1 = arith.constant 0 : i32
    return %arg0, %c0_i32, %c0_i32_0 : i32, i32, i32
  }
}

</mosaic_0001>

<bundles_post_ra>
// kernel: tpu_custom_call.1
= control target key start
LH: loop header
LB: loop body
LE: loop exit
PB: predicated region body
PF: predicated region fallthrough
CT: control target
= control target key end

     0   :  { %s1125_s0 = inlined_call_operand.hbm [shape: f32[4,16,16], index: 0, kind: input, shape index: {}]   ;;  %s1126_s1 = inlined_call_operand.hbm [shape: f32[4,16,16], index: 1, kind: input, shape index: {}]   ;;  %s1127_s2 = inlined_call_operand.hbm [shape: f32[16,16], index: 2, kind: input, shape index: {}]   ;;  %s1128_s3 = inlined_call_operand.hbm [shape: f32[4,16,16], index: 3, kind: output, shape index: {0}]   ;;  %s1129_s4 = inlined_call_operand.vmem [shape: f32[4,16,1], index: 4, kind: output, shape index: {1}]  }
   0x1   :  { %1137 = sst [smem:[#allocation14_spill]] %s1125_s0 }
   0x2   :  { %1138 = sst [smem:[#allocation15_spill]] %s1127_s2 }
   0x3   :  { %10 = vsyncpa [#allocation3], 0 }
   0x4   :  { %12 = vsyncpa [#allocation3 + $0x1], 0 }
   0x5   :  { %13 = vsyncpa [#allocation6], 0 }
   0x6   :  { %15 = vsyncpa [#allocation6 + $0x1], 0 }
   0x7   :  { %16 = vsyncpa [#allocation4], 0 }
   0x8   :  { %18 = vsyncpa [#allocation4 + $0x1], 0  ;;  %s866_s15 = smov 0   ;;  %s868_s16 = smov 0  }
   0x9   :  { %s870_s17 = smov 0   ;;  %s872_s18 = smov 0  }
   0xa LB: > { %s887_s19 = sadd.s32 4294967295, %s831_s18   ;;  %s556_s20 = sadd.s32 4294967294, %s831_s18   ;;  %s831_s18 = sphi %s872_s18, %s1160_s18   ;;  %s827_s17 = sphi %s870_s17, %s1159_s17   ;;  %s823_s16 = sphi %s868_s16, %s1158_s16   ;;  %s819_s15 = sphi %s866_s15, %s1157_s15  }
   0xb   : > { %p44_p0 = scmp.ne.s32.totalorder %s823_s16, %s819_s15  ;;  %p1130_p1 = scmp.eq.s32.totalorder %s887_s19, 0 }
   0xc   : > { %p121_p3 = scmp.eq.s32.totalorder %s556_s20, 3  ;;  %p557_p5 = scmp.ge.s32.totalorder %s831_s18, 1 }
   0xd   : > { %p896_p4 = por %p1130_p1, %p44_p0  ;;  %p154_p7 = scmp.lt.s32.totalorder %s831_s18, 5 }
   0xe   : > { %p901_p6 = por %p121_p3, %p44_p0  ;;  %s833_s24 = smov [#allocation7]  }
   0xf   : > { %s1139_s21 = scalar_select %p896_p4, 1, 0 }
  0x10   : > { %s1140_s22 = scalar_select %p901_p6, 1, 0 }
  0x11   : > { %p906_p8 = pnand %p557_p5, %p154_p7  ;;  %s166_s25 = sshll.u32 %s833_s24, 4  ;;  %s167_s25 = int_to_ptr.vmem [resolvable:$true] %s166_s25 }
  0x12   : > { %s919_s27 = sadd.s32 1, %s831_s18   ;;  %s31_s28 = sadd.s32 1, %s827_s17 }
  0x13   : > { %s1141_s23 = scalar_select %p906_p8, 1, 0 }
  0x14   : > { %p613_p9 = pneg %p906_p8  ;;  %s28_s29 = ssub.s32 %s831_s18, %s919_s27 }
  0x15   : > { %s1143_s2 = sld [smem:[#allocation15_spill]] }
  0x16   : > { %p914_p10 = pnand %p613_p9, %p1130_p1 }
  0x18   : > { %p671_p12 = pneg %p914_p10 }
  0x1b   : > { %s669_s6 = scalar_lea.hbm %s1143_s2, 256 }
  0x1c   : > { %p670_p11 = scmp.ne.s32.totalorder %s1143_s2, %s669_s6  ;;  %p676_p3 = scmp.lt.u32.totalorder %s669_s6, %s1143_s2 }
  0x1e   : > { %p672_p13 = pnand %p671_p12, %p670_p11 }
  0x20   : > { %p673_p0 = pneg %p672_p13 }
  0x22   : > { %p678_p5 = pnand %p676_p3, %p673_p0 }
  0x24   : > { %681 = shalt.err (!%p678_p5)
}
  0x25   : > { %s682_s11 = scalar_lea.vmem %s167_s25, 256  ;;  %p690_p2 = scmp.lt.s32.totalorder %s167_s25, %s167_s25 }
  0x26   : > { %p683_p7 = scmp.ne.s32.totalorder %s167_s25, %s682_s11  ;;  %p691_p6 = scmp.lt.s32.totalorder %s682_s11, %s682_s11 }
  0x28   : > { %p685_p9 = pnand %p683_p7, %p671_p12  ;;  %p692_p4 = por %p691_p6, %p690_p2 }
  0x2a   : > { %p686_p1 = pneg %p685_p9 }
  0x2c   : > { %p693_p8 = pnand %p692_p4, %p686_p1 }
  0x2e   : > { %696 = shalt.err (!%p693_p8)
}
  0x2f   : > { %s1133_s12 = smov 128   ;;  %s1135_s13 = smov 8  }
  0x30   : > { %616 = dma.hbm_to_vmem [thread:$0]  (!%p914_p10), %s1143_s2, 256, %s167_s25, [#allocation6], %s1133_s12, %s1133_s12, %s1135_s13  }
  0x31   : > { %p29_p1 = scmp.eq.s32.totalorder %s28_s29, 0  ;;  %p38_p2 = scmp.ne.s32.totalorder %s827_s17, %s823_s16 }
  0x32   : > { %p39_p4 = scmp.eq.s32.totalorder %s831_s18, 0  ;;  %p629_p6 = scmp.lt.s32.totalorder %s831_s18, 4 }
  0x33   : > { %s948_s24 = scalar_select %p29_p1, %s827_s17, %s31_s28  }
  0x34   : > { %p40_p8 = por %p39_p4, %p38_p2  ;;  %p1145_p11 = scmp.eq.s32.totalorder %s887_s19, 3 }
  0x35   : > { %1144 = sst [smem:[#allocation13_spill]] %s948_s24  ;;  %s180_s26 = sand.u32 1, %s827_s17  }
  0x36   : > { %p952_p12 = por %p1145_p11, %p38_p2  ;;  %s582_s5 = sshll.u32 %s831_s18, 8 }
  0x37   : > { %s958_s6 = sshll.u32 %s180_s26, 4  ;;  %s1147_s0 = sld [smem:[#allocation14_spill]] }
  0x38   : > { %s184_s28 = scalar_lea.vmem [#allocation2], %s958_s6  ;;  %p966_p10 = pnand %p629_p6, %p40_p8 }
  0x39   : > { %s191_s29 = sshll.u32 %s184_s28, 4  ;;  %s975_s14 = scalar_lea.hbm %s1126_s1, %s582_s5  ;;  %s970_s29 = int_to_ptr.vmem [resolvable:$true] %s191_s29 }
  0x3a   : > { %s977_s20 = scalar_lea.sflag [#allocation3], %s180_s26  ;;  %p699_p0 = pneg %p966_p10 }
  0x3d   : > { %s963_s25 = scalar_lea.hbm %s1147_s0, %s582_s5  ;;  %s702_s12 = scalar_lea.hbm %s1147_s0, 1024 }
  0x3e   : > { %s697_s7 = scalar_lea.hbm %s963_s25, 256  ;;  %p703_p7 = scmp.lt.u32.totalorder %s963_s25, %s1147_s0 }
  0x3f   : > { %p698_p13 = scmp.ne.s32.totalorder %s963_s25, %s697_s7  ;;  %p704_p9 = scmp.lt.u32.totalorder %s702_s12, %s697_s7 }
  0x40   : > { %p706_p2 = scmp.lt.u32.totalorder %s697_s7, %s963_s25 }
  0x41   : > { %p700_p3 = pnand %p699_p0, %p698_p13  ;;  %p705_p1 = por %p704_p9, %p703_p7 }
  0x43   : > { %p701_p5 = pneg %p700_p3  ;;  %p707_p4 = por %p706_p2, %p705_p1 }
  0x45   : > { %p708_p6 = pnand %p707_p4, %p701_p5 }
  0x47   : > { %711 = shalt.err (!%p708_p6)
}
  0x48   : > { %s712_s26 = scalar_lea.vmem %s970_s29, 256  ;;  %s836_s5 = smov [#allocation2]  }
  0x49   : > { %p713_p8 = scmp.ne.s32.totalorder %s970_s29, %s712_s26  ;;  %s717_s10 = sshll.u32 %s836_s5, 4  ;;  %s718_s10 = int_to_ptr.vmem [resolvable:$false] %s717_s10 }
  0x4a   : > { %s719_s2 = scalar_lea.vmem %s718_s10, 512  ;;  %p720_p3 = scmp.lt.s32.totalorder %s970_s29, %s718_s10 }
  0x4b   : > { %p715_p11 = pnand %p713_p8, %p699_p0  ;;  %p721_p7 = scmp.lt.s32.totalorder %s719_s2, %s712_s26 }
  0x4d   : > { %p716_p13 = pneg %p715_p11  ;;  %p722_p9 = por %p721_p7, %p720_p3 }
  0x4f   : > { %p723_p1 = pnand %p722_p9, %p716_p13 }
  0x51   : > { %726 = shalt.err (!%p723_p1)
}
  0x52   : > { %s1149_s12 = smov 8   ;;  %s1150_s13 = smov 128  }
  0x53   : > { %620 = dma.hbm_to_vmem [thread:$0]  (!%p966_p10), %s963_s25, 256, %s970_s29, %s977_s20, %s1150_s13, %s1150_s13, %s1149_s12  }
  0x54   : > { %s205_s11 = scalar_lea.vmem [#allocation5], %s958_s6  ;;  %s201_s8 = sand.u32 1, %s831_s18  }
  0x55   : > { %s212_s7 = sshll.u32 %s205_s11, 4  ;;  %s1012_s28 = scalar_lea.sflag [#allocation6], %s201_s8  ;;  %s1010_s7 = int_to_ptr.vmem [resolvable:$true] %s212_s7 }
  0x56   : > { %s727_s26 = scalar_lea.hbm %s975_s14, 256  ;;  %s732_s2 = scalar_lea.hbm %s1126_s1, 1024 }
  0x57   : > { %p728_p5 = scmp.ne.s32.totalorder %s975_s14, %s727_s26  ;;  %p733_p6 = scmp.lt.u32.totalorder %s975_s14, %s1126_s1 }
  0x58   : > { %p734_p8 = scmp.lt.u32.totalorder %s732_s2, %s727_s26  ;;  %p736_p13 = scmp.lt.u32.totalorder %s727_s26, %s975_s14 }
  0x59   : > { %p730_p2 = pnand %p728_p5, %p699_p0 }
  0x5a   : > { %p735_p11 = por %p734_p8, %p733_p6 }
  0x5b   : > { %p731_p4 = pneg %p730_p2 }
  0x5c   : > { %p737_p3 = por %p736_p13, %p735_p11 }
  0x5e   : > { %p738_p7 = pnand %p737_p3, %p731_p4 }
  0x60   : > { %741 = shalt.err (!%p738_p7)
}
  0x61   : > { %s742_s6 = scalar_lea.vmem %s1010_s7, 256  ;;  %s837_s25 = smov [#allocation5]  }
  0x62   : > { %p743_p9 = scmp.ne.s32.totalorder %s1010_s7, %s742_s6  ;;  %s747_s29 = sshll.u32 %s837_s25, 4  ;;  %s748_s29 = int_to_ptr.vmem [resolvable:$false] %s747_s29 }
  0x63   : > { %s749_s0 = scalar_lea.vmem %s748_s29, 512  ;;  %p750_p2 = scmp.lt.s32.totalorder %s1010_s7, %s748_s29 }
  0x64   : > { %p745_p1 = pnand %p743_p9, %p699_p0  ;;  %p751_p6 = scmp.lt.s32.totalorder %s749_s0, %s742_s6 }
  0x66   : > { %p746_p5 = pneg %p745_p1  ;;  %p752_p8 = por %p751_p6, %p750_p2 }
  0x68   : > { %p753_p11 = pnand %p752_p8, %p746_p5 }
  0x6a   : > { %756 = shalt.err (!%p753_p11)
}
  0x6b   : > { %623 = dma.hbm_to_vmem [thread:$0]  (!%p966_p10), %s975_s14, 256, %s1010_s7, %s1012_s28, %s1150_s13, %s1150_s13, %s1149_s12  }
  0x6c   : > { %p1151_p0 = scmp.ne.s32.totalorder %s1141_s23, 0 }
  0x6d   : > { %s1044_s24 = sand.u32 (!%p1151_p0), 1, %s823_s16   ;;  %p1152_p4 = scmp.ne.s32.totalorder (!%p1151_p0), %s1139_s21, 0 }
  0x6e   : > { %224 = sbr.rel (%p1151_p0) target bundleno = 502 (0x1f6), region = 32  ;;  %s567_s20 = sshll.u32 (!%p1151_p0), %s1044_s24, 4 }
  0x6f   : > { %s227_s11 = scalar_lea.sflag (!%p1151_p0), [#allocation3], %s1044_s24  ;;  %s230_s8 = scalar_lea.vmem (!%p1151_p0), [#allocation2], %s567_s20 }
  0x75   : > { %802 = dma.done.wait (%p1152_p4), %s227_s11, 256  }
  0x76   : > { %804 = vsyncadd (%p1152_p4), %s227_s11, 4294967040  ;;  %s235_s9 = sand.u32 1, %s887_s19   ;;  %s239_s23 = scalar_lea.vmem [#allocation5], %s567_s20 }
  0x77   : > { %s236_s14 = scalar_lea.sflag [#allocation6], %s235_s9 }
  0x78   : > { %806 = dma.done.wait (%p1152_p4), %s236_s14, 256  }
  0x79   : > { %808 = vsyncadd (%p1152_p4), %s236_s14, 4294967040  ;;  %p1153_p10 = scmp.eq.s32.totalorder %s887_s19, 0 }
  0x7b   : > { %810 = dma.done.wait (%p1153_p10), [#allocation6], 256   ;;  %p1154_p13 = pmov %p1153_p10 }
  0x7c   : > { %vm287_vm0 = vcmask 130048   ;;  %v285_v0 = vld [vmem:[%s239_s23] sm:$0xff]  ;;  %v286_v1 = vld [vmem:[%s239_s23 + $0x8] sm:$0xff]  ;;  %s270_s21 = scalar_lea.vmem [#allocation8], %s567_s20  ;;  %s585_s13 = sshll.u32 %s887_s19, 8 }
  0x7d   : > { %812 = vsyncadd (%p1154_p13), [#allocation6], 4294967040  ;;  %v283_v2 = vld [vmem:[%s230_s8] sm:$0xff]  ;;  %v597_v3 = vpack.c.bf16 %v286_v1, %v285_v0  ;;  %v284_v4 = vld [vmem:[%s230_s8 + $0x8] sm:$0xff]  ;;  %s423_s12 = sshll.u32 %s270_s21, 4  ;;  %s1077_s26 = scalar_lea.hbm %s1128_s3, %s585_s13  ;;  %s1071_s12 = int_to_ptr.vmem [resolvable:$true] %s423_s12 }
  0x7e   : > { %vm598_vm1 = vmpackc.low %vm287_vm0, %vm287_vm0  ;;  %594 = vmatprep.mubr.msk.f32.mxu0 %vm287_vm0, %v283_v2  ;;  %v375_v5 = vld [vmem:[#allocation7] sm:$0xff]  ;;  %v376_v6 = vld [vmem:[#allocation7 + $0x8] sm:$0xff]  ;;  %s405_s5 = scalar_lea.sflag [#allocation4], %s1044_s24  ;;  %s757_s10 = scalar_lea.vmem %s1071_s12, 256 }
  0x7f   : > { %599 = vmatprep.subr.msk.bf16.mxu0 %vm598_vm1, %v597_v3  ;;  %vm377_vm2 = vcmp.gt.f32.partialorder %v375_v5, 0.0  ;;  %vm378_vm3 = vcmp.gt.f32.partialorder %v376_v6, 0.0  ;;  %p758_p3 = scmp.ne.s32.totalorder %s1071_s12, %s757_s10  ;;  %s838_s2 = smov [#allocation8]  }
  0x80   : > { %602 = vmatpush3.bf16.xpose.msk.msra.mxu0 %vm598_vm1, %v597_v3  ;;  %s761_s6 = sshll.u32 %s838_s2, 4  ;;  %s762_s6 = int_to_ptr.vmem [resolvable:$false] %s761_s6 }
  0x81   : > { %p759_p7 = pnand %p758_p3, %p952_p12  ;;  %s763_s25 = scalar_lea.vmem %s762_s6, 512 }
  0x82   : > { %p764_p1 = scmp.lt.s32.totalorder %s1071_s12, %s762_s6  ;;  %p765_p5 = scmp.lt.s32.totalorder %s763_s25, %s757_s10 }
  0x83   : > { %p760_p9 = pneg %p759_p7 }
  0x84   : > { %p766_p2 = por %p765_p5, %p764_p1 }
  0x86   : > { %p767_p6 = pnand %p766_p2, %p760_p9 }
  0x87   : > { %595 = vmatmul.mubr.msk.f32.vlgmr.msra.gmra.mrb[0].mxu0 %vm287_vm0, %v284_v4 }
 0x15a   : > { %v596_v7 = vpop.f32.mrb[0].mxu0 }
 0x15b   : > { %403 = vst.msk [vmem:[%s270_s21 + $0x8] sm:$0xff] %vm287_vm0, %v596_v7  ;;  %v366_v8 = vpop.f32.mrb[1].mxu0  ;;  %v380_v13 = vsel %vm378_vm3, %v596_v7, -inf  ;;  %v388_v14 = vmul.f32 %v596_v7, %v376_v6 }
 0x15c   : > { %402 = vst.msk [vmem:[%s270_s21] sm:$0xff] %vm287_vm0, %v366_v8  ;;  %v379_v9 = vsel %vm377_vm2, %v366_v8, -inf  ;;  %v387_v10 = vmul.f32 %v375_v5, %v366_v8  ;;  %v384_v15 = vsel %vm287_vm0, %v380_v13, -inf }
 0x15d   : > { %v381_v11 = vsel %vm287_vm0, %v379_v9, -inf  ;;  %v392_v16 = vsel %vm287_vm0, %v388_v14, 0.0 }
 0x15e   : > { %382 = vmax.xlane.f32.xlu1 %v381_v11  ;;  %v389_v12 = vsel %vm287_vm0, %v387_v10, 0.0 }
 0x15f   : > { %390 = vadd.xlane.f32.xlu0 %v389_v12 }
 0x162   : > { %385 = vmax.xlane.f32.xlu1 %v384_v15 }
 0x163   : > { %393 = vadd.xlane.f32.xlu0 %v392_v16 }
 0x164   : > { %770 = shalt.err (!%p767_p6)
}
 0x165   : > { %s771_s29 = scalar_lea.hbm %s1077_s26, 256  ;;  %s775_s11 = scalar_lea.hbm %s1128_s3, 1024 }
 0x166   : > { %p772_p8 = scmp.ne.s32.totalorder %s1077_s26, %s771_s29  ;;  %p776_p4 = scmp.lt.u32.totalorder %s1077_s26, %s1128_s3 }
 0x167   : > { %p777_p10 = scmp.lt.u32.totalorder %s775_s11, %s771_s29  ;;  %p779_p3 = scmp.lt.u32.totalorder %s771_s29, %s1077_s26 }
 0x168   : > { %p773_p11 = pnand %p772_p8, %p952_p12 }
 0x169   : > { %p778_p13 = por %p777_p10, %p776_p4 }
 0x16a   : > { %p774_p0 = pneg %p773_p11 }
 0x16b   : > { %p780_p7 = por %p779_p3, %p778_p13 }
 0x16d   : > { %p781_p9 = pnand %p780_p7, %p774_p0 }
 0x16f   : > { %784 = shalt.err (!%p781_p9)
}
 0x170   : > { %s839_s14 = smov 128   ;;  %s840_s23 = smov 8   ;;  %vm399_vm4 = vcmask 7168  }
 0x171   : > { %611 = dma.vmem_to_hbm [thread:$0]  (%p952_p12), %s1071_s12, 256, %s1077_s26, %s405_s5, %s839_s14, %s839_s14, %s840_s23  }
 0x172   : > { %p278_p1 = scmp.lt.s32.totalorder %s887_s19, 3 }
 0x174   : > { %s1162_s19 = smov (!%p278_p1, %s887_s19), 3 }
 0x175   : > { %s584_s21 = sshll.u32 %s1162_s19, 4 }
 0x176   : > { %s282_s28 = scalar_lea.vmem %s1129_s4, %s584_s21 }
 0x1eb   : > { %v383_v17 = vpop.xlane.xlu1 %382 }
 0x1ec   : > { %v391_v18 = vpop.xlane.xlu0 %390 }
 0x1ed   : > { %v395_v19 = vmul.f32 0.0625, %v391_v18 }
 0x1ef   : > { %v397_v20 = vsub.f32 %v383_v17, %v395_v19  ;;  %v386_v23 = vpop.xlane.xlu1 %385 }
 0x1f0   : > { %v394_v21 = vpop.xlane.xlu0 %393 }
 0x1f1   : > { %400 = vst.msk [vmem:[%s282_s28] sm:$0xff] %vm399_vm4, %v397_v20  ;;  %v396_v22 = vmul.f32 0.0625, %v394_v21 }
 0x1f3   : > { %v398_v24 = vsub.f32 %v386_v23, %v396_v22 }
 0x1f5   : > { %401 = vst.msk [vmem:[%s282_s28 + $0x8] sm:$0xff] %vm399_vm4, %v398_v24 }
 0x1f6 PF: > { %p631_p12 = scmp.ge.s32.totalorder %s831_s18, 2  ;;  %s441_s19 = sand.u32 1, %s819_s15  }
 0x1f7   : > { %p1155_p5 = scmp.ne.s32.totalorder %s1140_s22, 0  ;;  %s442_s30 = scalar_lea.sflag [#allocation4], %s441_s19 }
 0x1f9   : > { %p625_p2 = pnand %p631_p12, %p1155_p5 }
 0x1fb   : > { %814 = dma.done.wait (!%p625_p2), %s442_s30, 256  }
 0x1fc   : > { %816 = vsyncadd (!%p625_p2), %s442_s30, 4294967040  ;;  %s1156_s24 = sld [smem:[#allocation13_spill]]  ;;  %p21_p6 = scmp.ge.s32.totalorder %s919_s27, 6  }
 0x1fd   : > { %s1157_s15 = smov %s823_s16  ;;  %s1158_s16 = smov %s827_s17 }
 0x1fe   : > { %s1160_s18 = smov %s919_s27  ;;  %23 = sbr.rel (!%p21_p6) target bundleno = 10 (0xa), region = 106 }
 0x202   : > { %s1159_s17 = smov %s1156_s24 }
 0x205   :  { %455 = vsyncpa [#allocation3], 1 }
 0x206   :  { %457 = vsyncpa [#allocation3 + $0x1], 1 }
 0x207   :  { %458 = vsyncpa [#allocation6], 1 }
 0x208   :  { %460 = vsyncpa [#allocation6 + $0x1], 1 }
 0x209   :  { %461 = vsyncpa [#allocation4], 1 }
 0x20a   :  { %463 = vsyncpa [#allocation4 + $0x1], 1 }

</bundles_post_ra>
